<compile_context>
chip_gen: v7x
topology: tpu7x:2x2x1
jax: 0.10.0
libtpu: 0.0.40
codegen_flags: <defaults>
</compile_context>

<pallas_src>
import math

import jax
import jax.numpy as jnp
from jax.experimental import pallas as pl
from jax.experimental.pallas import tpu as pltpu


def _interp_matrix(in_size: int, out_size: int) -> jnp.ndarray:
    """(in_size, out_size) f32 matrix for 1-D linear interpolation, align_corners=True."""
    if out_size == 1 or in_size == 1:
        # Degenerate: every output samples input index 0 (matches PyTorch align_corners=True).
        return jnp.zeros((in_size, out_size), jnp.float32).at[0, :].set(1.0)
    pos = jnp.arange(out_size, dtype=jnp.float32) * ((in_size - 1) / (out_size - 1))
    i0 = jnp.clip(jnp.floor(pos).astype(jnp.int32), 0, in_size - 1)
    i1 = jnp.minimum(i0 + 1, in_size - 1)
    frac = pos - i0.astype(jnp.float32)
    cols = jnp.arange(out_size)
    w = jnp.zeros((in_size, out_size), jnp.float32)
    w = w.at[i0, cols].add(1.0 - frac)
    w = w.at[i1, cols].add(frac)
    return w


def _tdi_kernel(x_ref, w_ref, o_ref):
    # x_ref: (TM, P*T)   w_ref: (P*T, P*O) block-diagonal, gate folded in
    # o_ref: (TM, P*O)   single MXU matmul, f32 accumulate, cast on store.
    o_ref[...] = jnp.dot(
        x_ref[...], w_ref[...], preferred_element_type=jnp.float32
    ).astype(o_ref.dtype)


def _choose_pack_factor(m: int, t: int, o: int, max_out_width: int = 1024) -> int:
    """Pick P so packed last dims (P*T in, P*O out) are multiples of 128 (lane-dense)."""
    p_out = 128 // math.gcd(o, 128)              # minimal P making P*O % 128 == 0
    p_in = 128 // math.gcd(t, 128)               # minimal P making P*T % 128 == 0
    p_both = p_out * p_in // math.gcd(p_out, p_in)
    for p in (p_both, p_out):
        if p > 1 and p * o <= max_out_width and m % p == 0:
            return p
    return 1                                     # fall back to unpacked (still correct)


def _choose_row_tile(mp: int, win: int, wout: int, itemsize: int, block_rows: int) -> int:
    """Row tile: large (hide per-step overhead), within double-buffered VMEM budget,
    and >= 4 grid steps so v7x's two TensorCores both get work."""
    if mp < 8:
        return mp                                # full-extent block is always legal
    vmem_budget = 24 * 1024 * 1024               # headroom under 32 MiB scoped default
    per_row = (win + wout) * itemsize * 2        # x2: double-buffered in + out tiles
    tm = min(block_rows, max(8, vmem_budget // per_row))
    tm = min(tm, pl.cdiv(mp, 4))                 # keep the grid >= 4 steps (v7x megacore)
    tm = max(8, (tm + 7) // 8 * 8)               # sublane alignment
    return tm


def _interpolate_rows_pallas(x2, w_gated, *, block_rows=8192):
    """x2: (M, T) -> (M, O), out[m] = x2[m] @ w_gated (gate already folded into w)."""
    m, t = x2.shape
    o = w_gated.shape[1]

    # Lane-dense packing (free row-major regroup) + block-diagonal weight.
    p = _choose_pack_factor(m, t, o)
    mp = m // p
    win, wout = p * t, p * o
    x_packed = x2.reshape(mp, win)
    w_big = jnp.kron(jnp.eye(p, dtype=w_gated.dtype), w_gated) if p > 1 else w_gated
    w_big = w_big.astype(x2.dtype)               # stream native dtype (bf16 ok) into MXU

    tm = _choose_row_tile(mp, win, wout, jnp.dtype(x2.dtype).itemsize, block_rows)
    grid = (pl.cdiv(mp, tm),)                    # ragged tail handled by OOB block masking

    out = pl.pallas_call(
        _tdi_kernel,
        out_shape=jax.ShapeDtypeStruct((mp, wout), x2.dtype),
        grid_spec=pltpu.PrefetchScalarGridSpec(
            num_scalar_prefetch=0,
            grid=grid,
            in_specs=[
                pl.BlockSpec((tm, win), lambda i: (i, 0)),    # streaming row tile of x
                pl.BlockSpec((win, wout), lambda i: (0, 0)),  # resident gated weight
            ],
            out_specs=pl.BlockSpec((tm, wout), lambda i: (i, 0)),
        ),
        compiler_params=pltpu.CompilerParams(
            dimension_semantics=("parallel",),   # independent row tiles -> 2 TCs on v7x
        ),
    )(x_packed, w_big)

    return out.reshape(m, o)


def time_distributed_interpolation(x, output_size, mask=None, trainable=False,
                                    *, block_rows=8192, force_pallas=False):
    """JAX/Pallas port of TimeDistributedInterpolation.forward."""
    if x.ndim == 2:
        t_in = x.shape[-1]
        x2 = x
        reshape_out = lambda y: y
    elif x.ndim == 4:
        b, t_in, h, w = x.shape
        # Matches PyTorch x.contiguous().view(b*h*w, t): a raw row-major regrouping
        # of the (b, t, h, w) buffer — jnp.reshape is identical and free.
        x2 = x.reshape(b * h * w, t_in)
        reshape_out = lambda y: y.reshape(b, output_size, h, w)
    else:
        # TODO(synk): the 1-D degenerate branch of the PyTorch forward is not supported.
        raise ValueError("expected 2-D or 4-D input")

    w_gated = _interp_matrix(t_in, output_size)
    if trainable:
        if mask is None:
            # nn.Parameter(torch.zeros(output_size)) default init.
            mask = jnp.zeros((output_size,), jnp.float32)
        gate = jax.nn.sigmoid(mask.astype(jnp.float32)) * 2.0
        w_gated = w_gated * gate[None, :]        # fold per-column gate into the weight

    m = x2.shape[0]
    tiny = m * (t_in + output_size) * jnp.dtype(x2.dtype).itemsize < (1 << 20)
    if tiny and not force_pallas:
        # Standalone pallas_call launch overhead dominates at this size; let XLA fuse it.
        y2 = jnp.dot(x2, w_gated.astype(x2.dtype),
                     preferred_element_type=jnp.float32).astype(x2.dtype)
    else:
        y2 = _interpolate_rows_pallas(x2, w_gated, block_rows=block_rows)
    return reshape_out(y2)


if __name__ == "__main__":
    # Small shapes consistent with the module: batch=2, time=8, spatial=16x16,
    # output_size (hidden) = 32, trainable gate with default zero-init mask.
    B, T, H, W = 2, 8, 16, 16
    OUT = 32

    key = jax.random.PRNGKey(0)
    x = jax.random.normal(key, (B, T, H, W), dtype=jnp.float32)
    mask = jnp.zeros((OUT,), dtype=jnp.float32)

    out = time_distributed_interpolation(x, OUT, mask=mask, trainable=True,
                                         force_pallas=True)
    out = jax.block_until_ready(out)
    assert out.shape == (B, OUT, H, W)

    # Pure-JAX reference with identical forward semantics.
    x2 = x.reshape(B * H * W, T)
    xp = jnp.arange(T, dtype=jnp.float32)
    pos = jnp.linspace(0.0, float(T - 1), OUT)
    up = jax.vmap(lambda row: jnp.interp(pos, xp, row))(x2)
    up = up * jax.nn.sigmoid(mask)[None, :] * 2.0
    ref = up.reshape(B, OUT, H, W)

    assert jnp.allclose(out, ref, atol=1e-4, rtol=1e-4), "mismatch vs reference"
    print("KERNEL_OK")
</pallas_src>

<mosaic_0001>
module attributes {stable_mosaic.version = 11 : i64} {
  func.func @_tdi_kernel(%arg0: i32, %arg1: memref<8x128xf32, #tpu.memory_space<vmem>>, %arg2: memref<128x512xf32, #tpu.memory_space<vmem>>, %arg3: memref<8x512xf32, #tpu.memory_space<vmem>>) attributes {dimension_semantics = [#tpu.dimension_semantics<parallel>], iteration_bounds = array<i64: 4>, scalar_prefetch = 0 : i64, scratch_operands = 0 : i64, tpu.core_type = #tpu.core_type<tc>, window_params = [{transform_indices = @transform_0, window_bounds = array<i64: 8, 128>}, {pipeline_mode = #tpu.pipeline_mode<synchronous>, transform_indices = @transform_1, window_bounds = array<i64: 128, 512>}, {transform_indices = @transform_2, window_bounds = array<i64: 8, 512>}]} {
    %c0 = arith.constant 0 : index
    %c0_0 = arith.constant 0 : index
    %0 = vector.load %arg1[%c0, %c0_0] : memref<8x128xf32, #tpu.memory_space<vmem>>, vector<8x128xf32>
    %c0_1 = arith.constant 0 : index
    %c0_2 = arith.constant 0 : index
    %1 = vector.load %arg2[%c0_1, %c0_2] : memref<128x512xf32, #tpu.memory_space<vmem>>, vector<128x512xf32>
    %cst = arith.constant dense<0.000000e+00> : vector<8x512xf32>
    %2 = tpu.matmul %0, %1, %cst {dimension_numbers = #tpu.dot_dimension_numbers<[1], [0], [0], [1], [0, 0, 1, 1], [], []>} : vector<8x128xf32>, vector<128x512xf32>, vector<8x512xf32> -> vector<8x512xf32>
    %c0_3 = arith.constant 0 : index
    %c0_4 = arith.constant 0 : index
    %3 = vector.load %arg3[%c0_3, %c0_4] : memref<8x512xf32, #tpu.memory_space<vmem>>, vector<8x512xf32>
    tpu.vector_store %arg3[%c0_3, %c0_4], %2 {strides = array<i32>} : memref<8x512xf32, #tpu.memory_space<vmem>>, vector<8x512xf32>,
    return
  }
  func.func @transform_0(%arg0: i32) -> (i32, i32) {
    %c0_i32 = arith.constant 0 : i32
    %c0_i32_0 = arith.constant 0 : i32
    return %arg0, %c0_i32 : i32, i32
  }
  func.func @transform_1(%arg0: i32) -> (i32, i32) {
    %c0_i32 = arith.constant 0 : i32
    %c0_i32_0 = arith.constant 0 : i32
    %c0_i32_1 = arith.constant 0 : i32
    return %c0_i32, %c0_i32_0 : i32, i32
  }
  func.func @transform_2(%arg0: i32) -> (i32, i32) {
    %c0_i32 = arith.constant 0 : i32
    %c0_i32_0 = arith.constant 0 : i32
    return %arg0, %c0_i32 : i32, i32
  }
}

</mosaic_0001>

<bundles_post_ra>
// kernel: tpu_custom_call.1
= control target key start
LH: loop header
LB: loop body
LE: loop exit
PB: predicated region body
PF: predicated region fallthrough
CT: control target
= control target key end

     0   :  { %7 = vsyncpa [#allocation3], 0  ;;  %s962_s0 = inlined_call_operand.hbm [shape: f32[32,128], index: 0, kind: input, shape index: {}]   ;;  %s963_s1 = inlined_call_operand.hbm [shape: f32[128,512], index: 1, kind: input, shape index: {}]   ;;  %s964_s2 = inlined_call_operand.hbm [shape: f32[32,512], index: 2, kind: output, shape index: {}]  }
   0x1   :  { %9 = vsyncpa [#allocation3 + $0x1], 0 }
   0x2   :  { %10 = vsyncpa [#allocation6], 0 }
   0x3   :  { %11 = vsyncpa [#allocation4], 0 }
   0x4   :  { %13 = vsyncpa [#allocation4 + $0x1], 0  ;;  %s771_s9 = smov 0   ;;  %s773_s10 = smov 0  }
   0x5   :  { %s775_s11 = smov 0   ;;  %s777_s12 = smov 0  }
   0x6 LB: > { %s792_s13 = sadd.s32 4294967295, %s748_s12   ;;  %s480_s14 = sadd.s32 4294967294, %s748_s12   ;;  %s748_s12 = sphi %s777_s12, %s983_s12   ;;  %s744_s11 = sphi %s775_s11, %s982_s11   ;;  %s740_s10 = sphi %s773_s10, %s981_s10   ;;  %s736_s9 = sphi %s771_s9, %s980_s9  }
   0x7   : > { %p39_p0 = scmp.ne.s32.totalorder %s740_s10, %s736_s9  ;;  %p965_p1 = scmp.eq.s32.totalorder %s792_s13, 0 }
   0x8   : > { %p90_p3 = scmp.eq.s32.totalorder %s480_s14, 3  ;;  %p481_p5 = scmp.ge.s32.totalorder %s748_s12, 1 }
   0x9   : > { %p801_p4 = por %p965_p1, %p39_p0  ;;  %p97_p7 = scmp.lt.s32.totalorder %s748_s12, 5 }
   0xa   : > { %p806_p6 = por %p90_p3, %p39_p0  ;;  %s750_s18 = smov [#allocation5]  }
   0xb   : > { %s968_s15 = scalar_select %p801_p4, 1, 0 }
   0xc   : > { %s969_s16 = scalar_select %p806_p6, 1, 0 }
   0xd   : > { %p811_p8 = pnand %p481_p5, %p97_p7  ;;  %s109_s19 = sshll.u32 %s750_s18, 4  ;;  %s110_s19 = int_to_ptr.vmem [resolvable:$true] %s109_s19 }
   0xe   : > { %s824_s21 = sadd.s32 1, %s748_s12   ;;  %s26_s22 = sadd.s32 1, %s744_s11 }
   0xf   : > { %s970_s17 = scalar_select %p811_p8, 1, 0 }
  0x10   : > { %p568_p9 = pneg %p811_p8  ;;  %s23_s23 = ssub.s32 %s748_s12, %s824_s21 }
  0x11   : > { %s620_s26 = scalar_lea.hbm %s963_s1, 8192 }
  0x12   : > { %p819_p10 = pnand %p568_p9, %p965_p1  ;;  %p621_p11 = scmp.ne.s32.totalorder %s963_s1, %s620_s26 }
  0x13   : > { %p627_p3 = scmp.lt.u32.totalorder %s620_s26, %s963_s1 }
  0x14   : > { %p622_p12 = pneg %p819_p10 }
  0x16   : > { %p623_p13 = pnand %p622_p12, %p621_p11 }
  0x18   : > { %p624_p0 = pneg %p623_p13 }
  0x1a   : > { %p629_p5 = pnand %p627_p3, %p624_p0 }
  0x1c   : > { %632 = shalt.err (!%p629_p5)
}
  0x1d   : > { %s633_s3 = scalar_lea.vmem %s110_s19, 8192  ;;  %p641_p2 = scmp.lt.s32.totalorder %s110_s19, %s110_s19 }
  0x1e   : > { %p634_p7 = scmp.ne.s32.totalorder %s110_s19, %s633_s3  ;;  %p642_p6 = scmp.lt.s32.totalorder %s633_s3, %s633_s3 }
  0x20   : > { %p636_p9 = pnand %p634_p7, %p622_p12  ;;  %p643_p4 = por %p642_p6, %p641_p2 }
  0x22   : > { %p637_p1 = pneg %p636_p9 }
  0x24   : > { %p644_p8 = pnand %p643_p4, %p637_p1 }
  0x26   : > { %647 = shalt.err (!%p644_p8)
}
  0x27   : > { %s751_s4 = smov 512   ;;  %s752_s5 = smov 32  }
  0x28   : > { %571 = dma.hbm_to_vmem [thread:$0]  (!%p819_p10), %s963_s1, 8192, %s110_s19, [#allocation6], %s751_s4, %s751_s4, %s752_s5  }
  0x29   : > { %p24_p11 = scmp.eq.s32.totalorder %s23_s23, 0  ;;  %p33_p2 = scmp.ne.s32.totalorder %s744_s11, %s740_s10 }
  0x2a   : > { %p34_p1 = scmp.eq.s32.totalorder %s748_s12, 0  ;;  %p581_p4 = scmp.lt.s32.totalorder %s748_s12, 4 }
  0x2b   : > { %s850_s8 = scalar_select %p24_p11, %s744_s11, %s26_s22  }
  0x2c   : > { %p35_p6 = por %p34_p1, %p33_p2  ;;  %p972_p8 = scmp.eq.s32.totalorder %s792_s13, 3 }
  0x2d   : > { %s123_s18 = sand.u32 1, %s744_s11   ;;  %s485_s24 = sshll.u32 %s748_s12, 7 }
  0x2e   : > { %p854_p12 = por %p972_p8, %p33_p2  ;;  %s484_s25 = sshll.u32 %s123_s18, 3 }
  0x2f   : > { %s863_s27 = scalar_lea.hbm %s962_s0, %s485_s24  ;;  %s127_s19 = scalar_lea.vmem [#allocation2], %s484_s25 }
  0x30   : > { %s134_s22 = sshll.u32 %s127_s19, 4  ;;  %p865_p10 = pnand %p581_p4, %p35_p6  ;;  %s869_s22 = int_to_ptr.vmem [resolvable:$true] %s134_s22 }
  0x31   : > { %s124_s28 = scalar_lea.sflag [#allocation3], %s123_s18  ;;  %s648_s29 = scalar_lea.hbm %s863_s27, 128 }
  0x32   : > { %p649_p13 = scmp.ne.s32.totalorder %s863_s27, %s648_s29  ;;  %p650_p0 = pneg %p865_p10 }
  0x33   : > { %s653_s4 = scalar_lea.hbm %s962_s0, 512  ;;  %p654_p7 = scmp.lt.u32.totalorder %s863_s27, %s962_s0 }
  0x34   : > { %p651_p3 = pnand %p650_p0, %p649_p13  ;;  %p655_p9 = scmp.lt.u32.totalorder %s653_s4, %s648_s29 }
  0x35   : > { %p657_p2 = scmp.lt.u32.totalorder %s648_s29, %s863_s27 }
  0x36   : > { %p652_p5 = pneg %p651_p3  ;;  %p656_p11 = por %p655_p9, %p654_p7 }
  0x38   : > { %p658_p1 = por %p657_p2, %p656_p11 }
  0x3a   : > { %p659_p4 = pnand %p658_p1, %p652_p5 }
  0x3c   : > { %662 = shalt.err (!%p659_p4)
}
  0x3d   : > { %s663_s7 = scalar_lea.vmem %s869_s22, 128  ;;  %s753_s18 = smov [#allocation2]  }
  0x3e   : > { %p664_p6 = scmp.ne.s32.totalorder %s869_s22, %s663_s7  ;;  %s668_s24 = sshll.u32 %s753_s18, 4  ;;  %s669_s24 = int_to_ptr.vmem [resolvable:$false] %s668_s24 }
  0x3f   : > { %s670_s25 = scalar_lea.vmem %s669_s24, 256  ;;  %p671_p3 = scmp.lt.s32.totalorder %s869_s22, %s669_s24 }
  0x40   : > { %p666_p8 = pnand %p664_p6, %p650_p0  ;;  %p672_p7 = scmp.lt.s32.totalorder %s670_s25, %s663_s7 }
  0x42   : > { %p667_p13 = pneg %p666_p8  ;;  %p673_p9 = por %p672_p7, %p671_p3 }
  0x44   : > { %p674_p11 = pnand %p673_p9, %p667_p13 }
  0x46   : > { %677 = shalt.err (!%p674_p11)
}
  0x47   : > { %575 = dma.hbm_to_vmem [thread:$0]  (!%p865_p10), %s863_s27, 128, %s869_s22, %s124_s28  }
  0x48   : > { %p975_p5 = scmp.ne.s32.totalorder %s970_s17, 0 }
  0x49   : > { %s899_s20 = sand.u32 (!%p975_p5), 1, %s740_s10   ;;  %p976_p0 = scmp.ne.s32.totalorder (!%p975_p5), %s968_s15, 0 }
  0x4a   : > { %143 = sbr.rel (%p975_p5) target bundleno = 349 (0x15d), region = 28  ;;  %s487_s26 = sshll.u32 (!%p975_p5), %s899_s20, 3 }
  0x4b   : > { %s146_s19 = scalar_lea.sflag (!%p975_p5), [#allocation3], %s899_s20  ;;  %s903_s29 = scalar_lea.vmem (!%p975_p5), [#allocation2], %s487_s26 }
  0x51   : > { %723 = dma.done.wait (%p976_p0), %s146_s19, 128  }
  0x52   : > { %725 = vsyncadd (%p976_p0), %s146_s19, 4294967168  ;;  %p977_p10 = scmp.eq.s32.totalorder %s792_s13, 0 }
  0x54   : > { %727 = dma.done.wait (%p977_p10), [#allocation6], 8192   ;;  %p978_p2 = pmov %p977_p10 }
  0x55   : > { %v754_v0 = vmov 0.0   ;;  %v176_v1 = vld [vmem:[#allocation5 + $0x8] sm:$0xff]  ;;  %v178_v3 = vld [vmem:[#allocation5 + $0x18] sm:$0xff]  ;;  %v175_v6 = vld [vmem:[#allocation5] sm:$0xff]  ;;  %s489_s15 = sshll.u32 %s899_s20, 5  ;;  %s495_s22 = sshll.u32 %s792_s13, 9 }
  0x56   : > { %729 = vsyncadd (%p978_p2), [#allocation6], 4294959104  ;;  %303 = vmatprep.mubr.f32.mxu0 %v754_v0  ;;  %374 = vmatprep.mubr.f32.mxu1 %v754_v0  ;;  %v180_v2 = vld [vmem:[#allocation5 + $0x28] sm:$0xff]  ;;  %v182_v5 = vld [vmem:[#allocation5 + $0x38] sm:$0xff]  ;;  %s173_s17 = scalar_lea.vmem [#allocation7], %s489_s15  ;;  %s921_s30 = scalar_lea.hbm %s964_s2, %s495_s22 }
  0x57   : > { %v496_v4 = vpack.c.bf16 %v180_v2, %v176_v1  ;;  %v179_v7 = vld [vmem:[#allocation5 + $0x20] sm:$0xff]  ;;  %v528_v8 = vpack.c.bf16 %v182_v5, %v178_v3  ;;  %v177_v10 = vld [vmem:[#allocation5 + $0x10] sm:$0xff]  ;;  %v184_v12 = vld [vmem:[#allocation5 + $0x48] sm:$0xff]  ;;  %s400_s27 = sshll.u32 %s173_s17, 4  ;;  %s386_s3 = scalar_lea.sflag [#allocation4], %s899_s20  ;;  %s916_s27 = int_to_ptr.vmem [resolvable:$true] %s400_s27 }
  0x58   : > { %v498_v9 = vpack.c.bf16 %v179_v7, %v175_v6  ;;  %v181_v11 = vld [vmem:[#allocation5 + $0x30] sm:$0xff]  ;;  %v188_v14 = vld [vmem:[#allocation5 + $0x68] sm:$0xff]  ;;  %v186_v15 = vld [vmem:[#allocation5 + $0x58] sm:$0xff]  ;;  %s678_s13 = scalar_lea.vmem %s916_s27, 512  ;;  %s755_s4 = smov [#allocation7]  }
  0x59   : > { %497 = vmatprep.subr.bf16.mxu0 %v496_v4  ;;  %v530_v13 = vpack.c.bf16 %v181_v11, %v177_v10  ;;  %v190_v16 = vld [vmem:[#allocation5 + $0x78] sm:$0xff]  ;;  %529 = vmatprep.subr.bf16.mxu1 %v528_v8  ;;  %v500_v17 = vpack.c.bf16 %v188_v14, %v184_v12  ;;  %v183_v19 = vld [vmem:[#allocation5 + $0x40] sm:$0xff]  ;;  %v185_v21 = vld [vmem:[#allocation5 + $0x50] sm:$0xff]  ;;  %p679_p1 = scmp.ne.s32.totalorder %s916_s27, %s678_s13  ;;  %s682_s5 = sshll.u32 %s755_s4, 4  ;;  %s683_s5 = int_to_ptr.vmem [resolvable:$false] %s682_s5 }
  0x5a   : > { %499 = vmatpush1.bf16.msra.mxu0 %v498_v9  ;;  %v532_v18 = vpack.c.bf16 %v190_v16, %v186_v15  ;;  %v187_v20 = vld [vmem:[#allocation5 + $0x60] sm:$0xff]  ;;  %v189_v23 = vld [vmem:[#allocation5 + $0x70] sm:$0xff]  ;;  %v192_v24 = vld [vmem:[#allocation5 + $0x88] sm:$0xff]  ;;  %s684_s6 = scalar_lea.vmem %s683_s5, 1024  ;;  %p685_p8 = scmp.lt.s32.totalorder %s916_s27, %s683_s5 }
  0x5b   : > { %531 = vmatpush1.bf16.msra.mxu1 %v530_v13  ;;  %v502_v22 = vpack.c.bf16 %v187_v20, %v183_v19  ;;  %v196_v25 = vld [vmem:[#allocation5 + $0xa8] sm:$0xff]  ;;  %501 = vmatprep.subr.bf16.mxu0 %v500_v17  ;;  %v534_v26 = vpack.c.bf16 %v189_v23, %v185_v21  ;;  %v194_v28 = vld [vmem:[#allocation5 + $0x98] sm:$0xff]  ;;  %v191_v30 = vld [vmem:[#allocation5 + $0x80] sm:$0xff]  ;;  %p680_p4 = pnand %p679_p1, %p854_p12  ;;  %p686_p13 = scmp.lt.s32.totalorder %s684_s6, %s678_s13 }
  0x5c   : > { %533 = vmatprep.subr.bf16.mxu1 %v532_v18  ;;  %v504_v27 = vpack.c.bf16 %v196_v25, %v192_v24  ;;  %v198_v29 = vld [vmem:[#allocation5 + $0xb8] sm:$0xff]  ;;  %v195_v32 = vld [vmem:[#allocation5 + $0xa0] sm:$0xff]  ;;  %v193_v33 = vld [vmem:[#allocation5 + $0x90] sm:$0xff] }
  0x5d   : > { %v536_v31 = vpack.c.bf16 %v198_v29, %v194_v28  ;;  %v197_v34 = vld [vmem:[#allocation5 + $0xb0] sm:$0xff]  ;;  %v506_v35 = vpack.c.bf16 %v195_v32, %v191_v30  ;;  %v200_v36 = vld [vmem:[#allocation5 + $0xc8] sm:$0xff]  ;;  %v202_v38 = vld [vmem:[#allocation5 + $0xd8] sm:$0xff]  ;;  %p681_p6 = pneg %p680_p4  ;;  %p687_p3 = por %p686_p13, %p685_p8 }
  0x5e   : > { %503 = vmatpush1.bf16.msra.mxu0 %v502_v22  ;;  %v204_v37 = vld [vmem:[#allocation5 + $0xe8] sm:$0xff]  ;;  %v538_v39 = vpack.c.bf16 %v197_v34, %v193_v33  ;;  %v206_v41 = vld [vmem:[#allocation5 + $0xf8] sm:$0xff]  ;;  %v199_v42 = vld [vmem:[#allocation5 + $0xc0] sm:$0xff] }
  0x5f   : > { %535 = vmatpush1.bf16.msra.mxu1 %v534_v26  ;;  %505 = vmatprep.subr.bf16.mxu0 %v504_v27  ;;  %v508_v40 = vpack.c.bf16 %v204_v37, %v200_v36  ;;  %v203_v43 = vld [vmem:[#allocation5 + $0xe0] sm:$0xff]  ;;  %v540_v44 = vpack.c.bf16 %v206_v41, %v202_v38  ;;  %v201_v45 = vld [vmem:[#allocation5 + $0xd0] sm:$0xff]  ;;  %v208_v47 = vld [vmem:[#allocation5 + $0x108] sm:$0xff]  ;;  %p688_p7 = pnand %p687_p3, %p681_p6 }
  0x60   : > { %537 = vmatprep.subr.bf16.mxu1 %v536_v31  ;;  %v205_v46 = vld [vmem:[#allocation5 + $0xf0] sm:$0xff]  ;;  %v212_v48 = vld [vmem:[#allocation5 + $0x128] sm:$0xff]  ;;  %v210_v49 = vld [vmem:[#allocation5 + $0x118] sm:$0xff]  ;;  %v510_v51 = vpack.c.bf16 %v203_v43, %v199_v42 }
  0x61   : > { %v214_v50 = vld [vmem:[#allocation5 + $0x138] sm:$0xff]  ;;  %v542_v52 = vpack.c.bf16 %v205_v46, %v201_v45  ;;  %v512_v53 = vpack.c.bf16 %v212_v48, %v208_v47  ;;  %v207_v54 = vld [vmem:[#allocation5 + $0x100] sm:$0xff]  ;;  %v209_v56 = vld [vmem:[#allocation5 + $0x110] sm:$0xff] }
  0x62   : > { %507 = vmatpush1.bf16.msra.mxu0 %v506_v35  ;;  %v211_v55 = vld [vmem:[#allocation5 + $0x120] sm:$0xff]  ;;  %v544_v57 = vpack.c.bf16 %v214_v50, %v210_v49  ;;  %v213_v58 = vld [vmem:[#allocation5 + $0x130] sm:$0xff]  ;;  %v216_v59 = vld [vmem:[#allocation5 + $0x148] sm:$0xff] }
  0x63   : > { %539 = vmatpush1.bf16.msra.mxu1 %v538_v39  ;;  %509 = vmatprep.subr.bf16.mxu0 %v508_v40  ;;  %v220_v60 = vld [vmem:[#allocation5 + $0x168] sm:$0xff]  ;;  %v218_v61 = vld [vmem:[#allocation5 + $0x158] sm:$0xff]  ;;  %v514_v63 = vpack.c.bf16 %v211_v55, %v207_v54  ;;  %v546_v0 = vpack.c.bf16 %v213_v58, %v209_v56  ;;  %v215_v2 = vld [vmem:[#allocation5 + $0x140] sm:$0xff] }
  0x64   : > { %541 = vmatprep.subr.bf16.mxu1 %v540_v44  ;;  %v222_v62 = vld [vmem:[#allocation5 + $0x178] sm:$0xff]  ;;  %v516_v1 = vpack.c.bf16 %v220_v60, %v216_v59  ;;  %v219_v3 = vld [vmem:[#allocation5 + $0x160] sm:$0xff]  ;;  %v217_v4 = vld [vmem:[#allocation5 + $0x150] sm:$0xff] }
  0x65   : > { %v548_v5 = vpack.c.bf16 %v222_v62, %v218_v61  ;;  %v221_v6 = vld [vmem:[#allocation5 + $0x170] sm:$0xff]  ;;  %v224_v7 = vld [vmem:[#allocation5 + $0x188] sm:$0xff]  ;;  %v226_v9 = vld [vmem:[#allocation5 + $0x198] sm:$0xff]  ;;  %v518_v11 = vpack.c.bf16 %v219_v3, %v215_v2 }
  0x66   : > { %511 = vmatpush1.bf16.msra.mxu0 %v510_v51  ;;  %v228_v8 = vld [vmem:[#allocation5 + $0x1a8] sm:$0xff]  ;;  %v230_v10 = vld [vmem:[#allocation5 + $0x1b8] sm:$0xff]  ;;  %v550_v12 = vpack.c.bf16 %v221_v6, %v217_v4  ;;  %v223_v14 = vld [vmem:[#allocation5 + $0x180] sm:$0xff] }
  0x67   : > { %543 = vmatpush1.bf16.msra.mxu1 %v542_v52  ;;  %513 = vmatprep.subr.bf16.mxu0 %v512_v53  ;;  %v520_v13 = vpack.c.bf16 %v228_v8, %v224_v7  ;;  %v227_v15 = vld [vmem:[#allocation5 + $0x1a0] sm:$0xff]  ;;  %v225_v16 = vld [vmem:[#allocation5 + $0x190] sm:$0xff]  ;;  %v552_v17 = vpack.c.bf16 %v230_v10, %v226_v9  ;;  %v232_v19 = vld [vmem:[#allocation5 + $0x1c8] sm:$0xff] }
  0x68   : > { %545 = vmatprep.subr.bf16.mxu1 %v544_v57  ;;  %v229_v18 = vld [vmem:[#allocation5 + $0x1b0] sm:$0xff]  ;;  %v236_v20 = vld [vmem:[#allocation5 + $0x1e8] sm:$0xff]  ;;  %v234_v21 = vld [vmem:[#allocation5 + $0x1d8] sm:$0xff]  ;;  %v522_v23 = vpack.c.bf16 %v227_v15, %v223_v14 }
  0x69   : > { %v238_v22 = vld [vmem:[#allocation5 + $0x1f8] sm:$0xff]  ;;  %v554_v24 = vpack.c.bf16 %v229_v18, %v225_v16  ;;  %v524_v25 = vpack.c.bf16 %v236_v20, %v232_v19  ;;  %v231_v26 = vld [vmem:[#allocation5 + $0x1c0] sm:$0xff]  ;;  %v233_v29 = vld [vmem:[#allocation5 + $0x1d0] sm:$0xff] }
  0x6a   : > { %515 = vmatpush1.bf16.msra.mxu0 %v514_v63  ;;  %v235_v27 = vld [vmem:[#allocation5 + $0x1e0] sm:$0xff]  ;;  %v556_v28 = vpack.c.bf16 %v238_v22, %v234_v21  ;;  %v237_v30 = vld [vmem:[#allocation5 + $0x1f0] sm:$0xff] }
  0x6b   : > { %547 = vmatpush1.bf16.msra.mxu1 %v546_v0  ;;  %517 = vmatprep.subr.bf16.mxu0 %v516_v1  ;;  %v526_v31 = vpack.c.bf16 %v235_v27, %v231_v26  ;;  %v558_v32 = vpack.c.bf16 %v237_v30, %v233_v29  ;;  %v174_v33 = vld [vmem:[%s903_s29] sm:$0xff] }
  0x6c   : > { %549 = vmatprep.subr.bf16.mxu1 %v548_v5 }
  0x6e   : > { %519 = vmatpush1.bf16.msra.mxu0 %v518_v11 }
  0x6f   : > { %551 = vmatpush1.bf16.msra.mxu1 %v550_v12  ;;  %521 = vmatprep.subr.bf16.mxu0 %v520_v13 }
  0x70   : > { %553 = vmatprep.subr.bf16.mxu1 %v552_v17 }
  0x72   : > { %523 = vmatpush1.bf16.msra.mxu0 %v522_v23 }
  0x73   : > { %555 = vmatpush1.bf16.msra.mxu1 %v554_v24  ;;  %525 = vmatprep.subr.bf16.mxu0 %v524_v25 }
  0x74   : > { %557 = vmatprep.subr.bf16.mxu1 %v556_v28 }
  0x76   : > { %527 = vmatpush1.bf16.msra.mxu0 %v526_v31 }
  0x77   : > { %559 = vmatpush1.bf16.msra.mxu1 %v558_v32 }
  0x79   : > { %304 = vmatmul.mubr.f32.vlgmr.msra.gmra.mrb[0].mxu0 %v174_v33 }
  0x7a   : > { %375 = vmatmul.mubr.f32.vlgmr.msra.gmra.mrb[0].mxu1 %v174_v33 }
 0x14c   : > { %v305_v34 = vpop.f32.mrb[0].mxu0 }
 0x14d   : > { %381 = vst [vmem:[%s173_s17] sm:$0xff] %v305_v34  ;;  %v376_v35 = vpop.f32.mrb[0].mxu1  ;;  %v307_v36 = vpop.f32.mrb[1].mxu0 }
 0x14e   : > { %383 = vst [vmem:[%s173_s17 + $0x10] sm:$0xff] %v376_v35  ;;  %382 = vst [vmem:[%s173_s17 + $0x8] sm:$0xff] %v307_v36  ;;  %v378_v37 = vpop.f32.mrb[1].mxu1 }
 0x14f   : > { %384 = vst [vmem:[%s173_s17 + $0x18] sm:$0xff] %v378_v37 }
 0x150   : > { %691 = shalt.err (!%p688_p7)
}
 0x151   : > { %s692_s7 = scalar_lea.hbm %s921_s30, 512  ;;  %s696_s25 = scalar_lea.hbm %s964_s2, 2048 }
 0x152   : > { %p693_p9 = scmp.ne.s32.totalorder %s921_s30, %s692_s7  ;;  %p697_p0 = scmp.lt.u32.totalorder %s921_s30, %s964_s2 }
 0x153   : > { %p698_p10 = scmp.lt.u32.totalorder %s696_s25, %s692_s7  ;;  %p700_p1 = scmp.lt.u32.totalorder %s692_s7, %s921_s30 }
 0x154   : > { %p694_p11 = pnand %p693_p9, %p854_p12 }
 0x155   : > { %p699_p2 = por %p698_p10, %p697_p0 }
 0x156   : > { %p695_p5 = pneg %p694_p11 }
 0x157   : > { %p701_p4 = por %p700_p1, %p699_p2 }
 0x159   : > { %p702_p6 = pnand %p701_p4, %p695_p5 }
 0x15b   : > { %705 = shalt.err (!%p702_p6)
}
 0x15c   : > { %566 = dma.vmem_to_hbm [thread:$0]  (%p854_p12), %s916_s27, 512, %s921_s30, %s386_s3  }
 0x15d PF: > { %p583_p8 = scmp.ge.s32.totalorder %s748_s12, 2  ;;  %s412_s19 = sand.u32 1, %s736_s9  }
 0x15e   : > { %p979_p13 = scmp.ne.s32.totalorder %s969_s16, 0  ;;  %s413_s29 = scalar_lea.sflag [#allocation4], %s412_s19 }
 0x160   : > { %p577_p3 = pnand %p583_p8, %p979_p13 }
 0x162   : > { %731 = dma.done.wait (!%p577_p3), %s413_s29, 512  }
 0x163   : > { %733 = vsyncadd (!%p577_p3), %s413_s29, 4294966784  ;;  %p16_p7 = scmp.ge.s32.totalorder %s824_s21, 6   ;;  %s980_s9 = smov %s740_s10 }
 0x164   : > { %s981_s10 = smov %s744_s11  ;;  %s982_s11 = smov %s850_s8 }
 0x165   : > { %s983_s12 = smov %s824_s21  ;;  %18 = sbr.rel (!%p16_p7) target bundleno = 6 (0x6), region = 77 }
 0x16c   :  { %418 = vsyncpa [#allocation3], 1 }
 0x16d   :  { %420 = vsyncpa [#allocation3 + $0x1], 1 }
 0x16e   :  { %421 = vsyncpa [#allocation6], 1 }
 0x16f   :  { %422 = vsyncpa [#allocation4], 1 }
 0x170   :  { %424 = vsyncpa [#allocation4 + $0x1], 1 }

</bundles_post_ra>
